<compile_context>
chip_gen: v7x
topology: tpu7x:2x2x1
jax: 0.10.0
libtpu: 0.0.40
codegen_flags: <defaults>
</compile_context>

<pallas_src>
import math

import jax
import jax.numpy as jnp
from jax.experimental import pallas as pl
from jax.experimental.pallas import tpu as pltpu


# -----------------------------------------------------------------------------
# Pallas kernel: lane-shaped partial-sum accumulation -> fused linear -> GELU
# -----------------------------------------------------------------------------
def _slowfast_encoder_kernel(x_ref, w_ref, b_ref, o_ref, acc_ref):
    # x_ref  : (Bt, T*C, t_hw)      -- one batch group, one H*W lane tile
    # w_ref  : (T*C, E) f32         -- fused weight (slow+fast pathways, head, proj, means)
    # b_ref  : (1, E) f32           -- fused bias
    # o_ref  : (Bt, E)
    # acc_ref: (Bt, T*C, t_hw) f32  -- lane-shaped partial accumulator (reduce deferred)
    s = pl.program_id(1)
    x = x_ref[...].astype(jnp.float32)

    @pl.when(s == 0)
    def _():
        acc_ref[...] = x                      # init (no extra zero pass)

    @pl.when(s > 0)
    def _():
        acc_ref[...] += x                     # pure VALU add, co-issues with vld

    @pl.when(s == pl.num_programs(1) - 1)
    def _():
        sums = jnp.sum(acc_ref[...], axis=2)  # (Bt, T*C) -- the single deferred lane reduce
        proj = jnp.dot(sums, w_ref[...], preferred_element_type=jnp.float32) + b_ref[...]
        # exact GELU (matches torch.nn.GELU() default, erf form)
        inv_sqrt2 = jnp.float32(1.0 / math.sqrt(2.0))
        o_ref[...] = (0.5 * proj * (1.0 + jax.lax.erf(proj * inv_sqrt2))).astype(o_ref.dtype)


# -----------------------------------------------------------------------------
# Tiling heuristics
# -----------------------------------------------------------------------------
_MAX_BLOCK_BYTES = 4 * 1024 * 1024  # x tile budget: 2x double-buffered + 1 f32 acc ~= 12 MiB VMEM


def _pick_tiles(B, TC, HW, itemsize):
    """Returns (batch_tile, hw_tile, hw_padded)."""
    slab = TC * HW * itemsize                     # bytes of one batch element
    if slab <= _MAX_BLOCK_BYTES:
        # Small-frame case: full H*W in lanes, batch several elements per grid step.
        cap = max(1, _MAX_BLOCK_BYTES // slab)
        cands = [d for d in range(1, B + 1) if B % d == 0 and d <= cap]
        if B >= 4:
            # keep >= 2 parallel batch groups so both v7x TensorCores get work
            halved = [d for d in cands if d <= B // 2]
            cands = halved or cands
        return max(cands), HW, HW
    # Large-frame case: one batch element per step, tile H*W along lanes.
    # TODO(synk): for B == 1 on v7x, the H*W reduction could additionally be split across
    # the two TensorCores; not done here.
    hw_pad = HW if HW % 128 == 0 else ((HW + 127) // 128) * 128  # zero-pad: harmless for sums
    budget = max(128, (_MAX_BLOCK_BYTES // (TC * itemsize)) // 128 * 128)
    t = budget
    while t > 128 and hw_pad % t != 0:
        t -= 128
    return 1, t, hw_pad


# -----------------------------------------------------------------------------
# Wrapper
# -----------------------------------------------------------------------------
@jax.jit
def slowfast50_encoder_forward(item_content, w1, b1, w2, b2):
    """item_content: (B, T, C, H, W) -> (B, embedding_dim) f32."""
    B, T, C, H, W = item_content.shape
    HW = H * W
    TC = T * C
    E = w2.shape[1]
    f32 = jnp.float32

    # Algebraic fusion of: slow(first+last)/fast frame selection, 1/(n_frames*HW) means,
    # stand-in head Linear(2C->400) and video_proj Linear(400->E) into one (T*C, E) weight.
    # Row (t*C + c) multiplies sum_{hw} x[b, t, c, hw].
    # TODO(synk): fusion only valid for the pool+linear stand-in, not a real backbone.
    ws = (w1[:C].astype(f32) @ w2.astype(f32)) * f32(1.0 / (2.0 * HW))  # slow: 2 frames * HW
    wf = (w1[C:].astype(f32) @ w2.astype(f32)) * f32(1.0 / (T * HW))    # fast: T frames * HW
    w_big = jnp.tile(wf, (T, 1))                                        # (T*C, E) fast rows
    w_big = w_big.at[0:C].add(ws)                                       # slow: frame 0
    w_big = w_big.at[(T - 1) * C:T * C].add(ws)                         # slow: frame T-1
    bias = (b1.astype(f32) @ w2.astype(f32) + b2.astype(f32)).reshape(1, E)

    # Free, contiguous reshape: (T, C) packed densely into sublanes, H*W into lanes.
    x = item_content.reshape(B, TC, HW)

    bt, t_hw, hw_pad = _pick_tiles(B, TC, HW, item_content.dtype.itemsize)
    if hw_pad != HW:
        # zero-padding the lane axis keeps sums exact (scales above use the true HW)
        x = jnp.pad(x, ((0, 0), (0, 0), (0, hw_pad - HW)))

    grid = (B // bt, hw_pad // t_hw)

    out = pl.pallas_call(
        _slowfast_encoder_kernel,
        out_shape=jax.ShapeDtypeStruct((B, E), jnp.float32),
        grid_spec=pltpu.PrefetchScalarGridSpec(
            num_scalar_prefetch=0,
            grid=grid,
            in_specs=[
                pl.BlockSpec((bt, TC, t_hw), lambda g, s: (g, 0, s)),
                pl.BlockSpec((TC, E), lambda g, s: (0, 0)),
                pl.BlockSpec((1, E), lambda g, s: (0, 0)),
            ],
            out_specs=pl.BlockSpec((bt, E), lambda g, s: (g, 0)),
            scratch_shapes=[pltpu.VMEM((bt, TC, t_hw), jnp.float32)],
        ),
        compiler_params=pltpu.CompilerParams(
            dimension_semantics=("parallel", "arbitrary"),
            vmem_limit_bytes=32 * 1024 * 1024,
        ),
    )(x, w_big, bias)
    return out


# -----------------------------------------------------------------------------
# Deterministic parameter construction (mirrors the module's __init__)
# -----------------------------------------------------------------------------
def init_params(key, channels, embedding_dim):
    k1, k2 = jax.random.split(key, 2)

    # stand-in video_net head: Linear(2C -> 400) on concat([slow_pool, fast_pool])
    w1 = 0.02 * jax.random.normal(k1, (2 * channels, 400), dtype=jnp.float32)
    b1 = jnp.zeros((1, 400), dtype=jnp.float32)

    # video_proj = nn.Linear(400, embedding_dim):
    #   xavier_normal_(weight) (torch weight shape: (E, 400)), bias = 0
    std = math.sqrt(2.0 / (400 + embedding_dim))
    w_torch = std * jax.random.normal(k2, (embedding_dim, 400), dtype=jnp.float32)
    w2 = w_torch.T                                       # (400, E) for row-major matmul
    b2 = jnp.zeros((1, embedding_dim), dtype=jnp.float32)
    return w1, b1, w2, b2


if __name__ == "__main__":
    B, T, C, H, W = 2, 8, 4, 16, 16
    EMB = 32

    key = jax.random.PRNGKey(0)
    k_in, k_par = jax.random.split(key)

    item_content = jax.random.normal(k_in, (B, T, C, H, W), dtype=jnp.float32)
    w1, b1, w2, b2 = init_params(k_par, C, EMB)

    out = slowfast50_encoder_forward(item_content, w1, b1, w2, b2)
    out = jax.block_until_ready(out)

    # pure-JAX reference of the same (stand-in) computation, un-fused, following the
    # PyTorch forward: transpose -> slow/fast pathways -> pool -> head -> proj -> GELU
    xt = jnp.transpose(item_content, (0, 2, 1, 3, 4))            # (B, C, T, H, W)
    slow = jnp.concatenate([xt[:, :, 0:1], xt[:, :, -1:]], axis=2)
    slow_pool = jnp.mean(slow, axis=(2, 3, 4))                   # (B, C)
    fast_pool = jnp.mean(xt, axis=(2, 3, 4))                     # (B, C)
    pooled = jnp.concatenate([slow_pool, fast_pool], axis=1)     # (B, 2C)
    feats = pooled @ w1 + b1
    proj = feats @ w2 + b2
    ref = 0.5 * proj * (1.0 + jax.lax.erf(proj / jnp.sqrt(2.0)))
    assert jnp.allclose(out, ref, atol=1e-5, rtol=1e-4), "mismatch vs reference"

    print("KERNEL_OK")
</pallas_src>

<mosaic_0001>
module attributes {stable_mosaic.version = 11 : i64} {
  func.func @_slowfast_encoder_kernel(%arg0: i32, %arg1: i32, %arg2: memref<2x32x256xf32, #tpu.memory_space<vmem>>, %arg3: memref<32x32xf32, #tpu.memory_space<vmem>>, %arg4: memref<1x32xf32, #tpu.memory_space<vmem>>, %arg5: memref<2x32xf32, #tpu.memory_space<vmem>>, %arg6: memref<2x32x256xf32, #tpu.memory_space<vmem>>) attributes {dimension_semantics = [#tpu.dimension_semantics<parallel>, #tpu.dimension_semantics<arbitrary>], iteration_bounds = array<i64: 1, 1>, scalar_prefetch = 0 : i64, scratch_operands = 1 : i64, tpu.core_type = #tpu.core_type<tc>, window_params = [{transform_indices = @transform_0, window_bounds = array<i64: 2, 32, 256>}, {pipeline_mode = #tpu.pipeline_mode<synchronous>, transform_indices = @transform_1, window_bounds = array<i64: 32, 32>}, {pipeline_mode = #tpu.pipeline_mode<synchronous>, transform_indices = @transform_2, window_bounds = array<i64: 1, 32>}, {transform_indices = @transform_3, window_bounds = array<i64: 2, 32>}]} {
    %c0 = arith.constant 0 : index
    %c0_0 = arith.constant 0 : index
    %c0_1 = arith.constant 0 : index
    %0 = vector.load %arg2[%c0, %c0_0, %c0_1] : memref<2x32x256xf32, #tpu.memory_space<vmem>>, vector<2x32x256xf32>
    %c0_i32 = arith.constant 0 : i32
    %1 = arith.cmpi eq, %arg1, %c0_i32 : i32
    %2 = arith.extui %1 : i1 to i32
    %c0_i32_2 = arith.constant 0 : i32
    %3 = arith.cmpi ne, %2, %c0_i32_2 : i32
    scf.if %3 {
      %c0_7 = arith.constant 0 : index
      %c0_8 = arith.constant 0 : index
      %c0_9 = arith.constant 0 : index
      %10 = vector.load %arg6[%c0_7, %c0_8, %c0_9] : memref<2x32x256xf32, #tpu.memory_space<vmem>>, vector<2x32x256xf32>
      tpu.vector_store %arg6[%c0_7, %c0_8, %c0_9], %0 {strides = array<i32>} : memref<2x32x256xf32, #tpu.memory_space<vmem>>, vector<2x32x256xf32>,
    } else {
    }
    %c0_i32_3 = arith.constant 0 : i32
    %4 = arith.cmpi sgt, %arg1, %c0_i32_3 : i32
    %5 = arith.extui %4 : i1 to i32
    %c0_i32_4 = arith.constant 0 : i32
    %6 = arith.cmpi ne, %5, %c0_i32_4 : i32
    scf.if %6 {
      %c0_7 = arith.constant 0 : index
      %c0_8 = arith.constant 0 : index
      %c0_9 = arith.constant 0 : index
      %10 = vector.load %arg6[%c0_7, %c0_8, %c0_9] : memref<2x32x256xf32, #tpu.memory_space<vmem>>, vector<2x32x256xf32>
      %11 = arith.addf %10, %0 : vector<2x32x256xf32>
      %c0_10 = arith.constant 0 : index
      %c0_11 = arith.constant 0 : index
      %c0_12 = arith.constant 0 : index
      %12 = vector.load %arg6[%c0_10, %c0_11, %c0_12] : memref<2x32x256xf32, #tpu.memory_space<vmem>>, vector<2x32x256xf32>
      tpu.vector_store %arg6[%c0_10, %c0_11, %c0_12], %11 {strides = array<i32>} : memref<2x32x256xf32, #tpu.memory_space<vmem>>, vector<2x32x256xf32>,
    } else {
    }
    %c0_i32_5 = arith.constant 0 : i32
    %7 = arith.cmpi eq, %arg1, %c0_i32_5 : i32
    %8 = arith.extui %7 : i1 to i32
    %c0_i32_6 = arith.constant 0 : i32
    %9 = arith.cmpi ne, %8, %c0_i32_6 : i32
    scf.if %9 {
      %c0_7 = arith.constant 0 : index
      %c0_8 = arith.constant 0 : index
      %c0_9 = arith.constant 0 : index
      %10 = vector.load %arg6[%c0_7, %c0_8, %c0_9] : memref<2x32x256xf32, #tpu.memory_space<vmem>>, vector<2x32x256xf32>
      %cst = arith.constant dense<0.000000e+00> : vector<2x32xf32>
      %11 = vector.multi_reduction <add>, %10, %cst [2] : vector<2x32x256xf32> to vector<2x32xf32>
      %c0_10 = arith.constant 0 : index
      %c0_11 = arith.constant 0 : index
      %12 = vector.load %arg3[%c0_10, %c0_11] : memref<32x32xf32, #tpu.memory_space<vmem>>, vector<32x32xf32>
      %cst_12 = arith.constant dense<0.000000e+00> : vector<2x32xf32>
      %13 = tpu.matmul %11, %12, %cst_12 {dimension_numbers = #tpu.dot_dimension_numbers<[1], [0], [0], [1], [0, 0, 1, 1], [], []>} : vector<2x32xf32>, vector<32x32xf32>, vector<2x32xf32> -> vector<2x32xf32>
      %c0_13 = arith.constant 0 : index
      %c0_14 = arith.constant 0 : index
      %14 = vector.load %arg4[%c0_13, %c0_14] : memref<1x32xf32, #tpu.memory_space<vmem>>, vector<1x32xf32>
      %15 = vector.broadcast %14 : vector<1x32xf32> to vector<2x32xf32>
      %16 = arith.addf %13, %15 : vector<2x32xf32>
      %cst_15 = arith.constant 5.000000e-01 : f32
      %17 = vector.broadcast %cst_15 : f32 to vector<2x32xf32>
      %18 = arith.mulf %17, %16 : vector<2x32xf32>
      %cst_16 = arith.constant 0.707106769 : f32
      %19 = vector.broadcast %cst_16 : f32 to vector<2x32xf32>
      %20 = arith.mulf %16, %19 : vector<2x32xf32>
      %21 = math.erf %20 : vector<2x32xf32>
      %cst_17 = arith.constant 1.000000e+00 : f32
      %22 = vector.broadcast %cst_17 : f32 to vector<2x32xf32>
      %23 = arith.addf %22, %21 : vector<2x32xf32>
      %24 = arith.mulf %18, %23 : vector<2x32xf32>
      %c0_18 = arith.constant 0 : index
      %c0_19 = arith.constant 0 : index
      %25 = vector.load %arg5[%c0_18, %c0_19] : memref<2x32xf32, #tpu.memory_space<vmem>>, vector<2x32xf32>
      tpu.vector_store %arg5[%c0_18, %c0_19], %24 {strides = array<i32>} : memref<2x32xf32, #tpu.memory_space<vmem>>, vector<2x32xf32>,
    } else {
    }
    return
  }
  func.func @transform_0(%arg0: i32, %arg1: i32) -> (i32, i32, i32) {
    %c0_i32 = arith.constant 0 : i32
    %c0_i32_0 = arith.constant 0 : i32
    return %arg0, %c0_i32, %arg1 : i32, i32, i32
  }
  func.func @transform_1(%arg0: i32, %arg1: i32) -> (i32, i32) {
    %c0_i32 = arith.constant 0 : i32
    %c0_i32_0 = arith.constant 0 : i32
    %c0_i32_1 = arith.constant 0 : i32
    return %c0_i32, %c0_i32_0 : i32, i32
  }
  func.func @transform_2(%arg0: i32, %arg1: i32) -> (i32, i32) {
    %c0_i32 = arith.constant 0 : i32
    %c0_i32_0 = arith.constant 0 : i32
    %c0_i32_1 = arith.constant 0 : i32
    return %c0_i32, %c0_i32_0 : i32, i32
  }
  func.func @transform_3(%arg0: i32, %arg1: i32) -> (i32, i32) {
    %c0_i32 = arith.constant 0 : i32
    %c0_i32_0 = arith.constant 0 : i32
    return %arg0, %c0_i32 : i32, i32
  }
}

</mosaic_0001>

<bundles_post_ra>
// kernel: slowfast50_encoder_forward.1
= control target key start
LH: loop header
LB: loop body
LE: loop exit
PB: predicated region body
PF: predicated region fallthrough
CT: control target
= control target key end

     0   :  { %s460_s0 = inlined_call_operand.vmem [shape: f32[2,32,256], index: 0, kind: input, shape index: {}]   ;;  %s461_s1 = inlined_call_operand.vmem [shape: f32[32,32], index: 1, kind: input, shape index: {}]   ;;  %s462_s2 = inlined_call_operand.vmem [shape: f32[1,32], index: 2, kind: input, shape index: {}]   ;;  %s463_s3 = inlined_call_operand.hbm [shape: f32[2,32], index: 3, kind: output, shape index: {}]  }
   0x1   :  { %v23_v0 = vld [vmem:[%s460_s0 + $0x40] sm:$0xff]  ;;  %v24_v1 = vld [vmem:[%s460_s0 + $0x48] sm:$0xff]  ;;  %v25_v5 = vld [vmem:[%s460_s0 + $0x50] sm:$0xff] }
   0x2   :  { %v15_v2 = vld [vmem:[%s460_s0] sm:$0xff]  ;;  %v134_v3 = vadd.f32 %v24_v1, %v23_v0  ;;  %v16_v4 = vld [vmem:[%s460_s0 + $0x8] sm:$0xff]  ;;  %v26_v6 = vld [vmem:[%s460_s0 + $0x58] sm:$0xff] }
   0x3   :  { %v122_v7 = vadd.f32 %v16_v4, %v15_v2  ;;  %v17_v8 = vld [vmem:[%s460_s0 + $0x10] sm:$0xff]  ;;  %v18_v9 = vld [vmem:[%s460_s0 + $0x18] sm:$0xff]  ;;  %v137_v10 = vadd.f32 %v26_v6, %v25_v5  ;;  %v27_v12 = vld [vmem:[%s460_s0 + $0x60] sm:$0xff] }
   0x4   :  { %135 = vadd.xlane.f32.xlu1 %v134_v3  ;;  %v125_v11 = vadd.f32 %v18_v9, %v17_v8  ;;  %v28_v13 = vld [vmem:[%s460_s0 + $0x68] sm:$0xff]  ;;  %v19_v14 = vld [vmem:[%s460_s0 + $0x20] sm:$0xff] }
   0x5   :  { %123 = vadd.xlane.f32.xlu0 %v122_v7  ;;  %v20_v15 = vld [vmem:[%s460_s0 + $0x28] sm:$0xff] }
   0x6   :  { %8 = vsyncpa [#allocation4], 0  ;;  %v140_v16 = vadd.f32 %v28_v13, %v27_v12  ;;  %v128_v17 = vadd.f32 %v20_v15, %v19_v14  ;;  %v29_v18 = vld [vmem:[%s460_s0 + $0x70] sm:$0xff]  ;;  %v30_v19 = vld [vmem:[%s460_s0 + $0x78] sm:$0xff]  ;;  %v361_v27 = vmov 0.0|0.0   ;;  %vm362_vm0 = vmmov 0  }
   0x7   :  { %v21_v20 = vld [vmem:[%s460_s0 + $0x30] sm:$0xff]  ;;  %v22_v21 = vld [vmem:[%s460_s0 + $0x38] sm:$0xff]  ;;  %v143_v22 = vadd.f32 %v30_v19, %v29_v18  ;;  %v146_v24 = vld [vmem:[%s461_s1] sm:$0xff]  ;;  %325 = vmatprep.subr.bf16.mxu0 %v361_v27  ;;  %v363_v31 = vmov 0.0   ;;  %v165_v32 = vlaneseq  ;;  %vm176_vm1 = vcmask 130112   ;;  %s364_s25 = smov [#allocation3]  }
   0x8   :  { %138 = vadd.xlane.f32.xlu1 %v137_v10  ;;  %v131_v23 = vadd.f32 %v22_v21, %v21_v20  ;;  %v147_v25 = vld [vmem:[%s461_s1 + $0x8] sm:$0xff]  ;;  %v148_v28 = vld [vmem:[%s461_s1 + $0x10] sm:$0xff]  ;;  %v149_v29 = vld [vmem:[%s461_s1 + $0x18] sm:$0xff]  ;;  %322 = vmatprep.mubr.msk.f32.mxu0 %vm362_vm0, %v363_v31  ;;  %vm183_vm2 = vcmask 195712   ;;  %vm190_vm3 = vcmask 261312   ;;  %vm211_vm4 = vcmask 1041409  }
   0x9   :  { %126 = vadd.xlane.f32.xlu0 %v125_v11  ;;  %v326_v26 = vpack.c.bf16 %v147_v25, %v146_v24  ;;  %v329_v30 = vpack.c.bf16 %v149_v29, %v148_v28  ;;  %v166_v33 = vand.u32 127, %v165_v32  ;;  %v168_v38 = vshrl.u32 %v165_v32, 7  ;;  %v307_v1 = vld [vmem:[%s462_s2] ss:$0 sm:$0xff]  ;;  %s299_s26 = sshll.u32 %s364_s25, 4  ;;  %s300_s26 = int_to_ptr.vmem [resolvable:$true] %s299_s26 }
   0xa   :  { %vm213_vm5 = vcmask 261120   ;;  %vm291_vm6 = vcmask 254976   ;;  %s337_s27 = scalar_lea.vmem %s300_s26, 32  ;;  %p342_p1 = scmp.lt.s32.totalorder %s300_s26, %s300_s26 }
   0xb   :  { %327 = vmatpush3.bf16.msra.mxu0 %v326_v26  ;;  %v171_v36 = vadd.s32 4294967288, %v166_v33  ;;  %v178_v37 = vadd.s32 4294967280, %v166_v33  ;;  %v185_v42 = vadd.s32 4294967272, %v166_v33  ;;  %v169_v44 = vsub.s32 %v166_v33, %v168_v38  ;;  %p338_p0 = scmp.ne.s32.totalorder %s300_s26, %s337_s27  ;;  %p343_p2 = scmp.lt.s32.totalorder %s337_s27, %s337_s27 }
   0xc   :  { %141 = vadd.xlane.f32.xlu1 %v140_v16  ;;  %328 = vmatprep.subr.bf16.mxu0 %v361_v27 }
   0xd   :  { %129 = vadd.xlane.f32.xlu0 %v128_v17  ;;  %v174_v40 = vsub.s32 %v171_v36, %v168_v38  ;;  %v181_v43 = vsub.s32 %v178_v37, %v168_v38  ;;  %v188_v48 = vsub.s32 %v185_v42, %v168_v38  ;;  %p344_p3 = por %p343_p2, %p342_p1 }
   0xf   :  { %330 = vmatpush3.bf16.msra.mxu0 %v329_v30  ;;  %p345_p4 = pnand %p344_p3, %p338_p0 }
  0x10   :  { %144 = vadd.xlane.f32.xlu1 %v143_v22 }
  0x11   :  { %132 = vadd.xlane.f32.xlu0 %v131_v23 }
  0x91   :  { %v136_v34 = vpop.xlane.xlu1 %135 }
  0x92   :  { %v124_v35 = vpop.xlane.xlu0 %123  ;;  %v195_v51 = vrot.slane %v136_v34, %v169_v44 }
  0x93   :  { %v170_v53 = vrot.slane %v124_v35, %v169_v44 }
  0x95   :  { %v139_v39 = vpop.xlane.xlu1 %138 }
  0x96   :  { %v127_v41 = vpop.xlane.xlu0 %126  ;;  %v199_v46 = vrot.slane %v139_v39, %v174_v40 }
  0x97   :  { %v175_v49 = vrot.slane %v127_v41, %v174_v40 }
  0x98   :  { %v200_v55 = vsel %vm176_vm1, %v199_v46, %v195_v51 }
  0x99   :  { %v142_v45 = vpop.xlane.xlu1 %141  ;;  %v177_v58 = vsel %vm176_vm1, %v175_v49, %v170_v53 }
  0x9a   :  { %v130_v47 = vpop.xlane.xlu0 %129  ;;  %v204_v50 = vrot.slane %v142_v45, %v181_v43 }
  0x9b   :  { %v182_v52 = vrot.slane %v130_v47, %v181_v43 }
  0x9c   :  { %v205_v59 = vsel %vm183_vm2, %v204_v50, %v200_v55 }
  0x9d   :  { %v145_v54 = vpop.xlane.xlu1 %144  ;;  %v184_v61 = vsel %vm183_vm2, %v182_v52, %v177_v58 }
  0x9e   :  { %v209_v56 = vrot.slane %v145_v54, %v188_v48  ;;  %v133_v57 = vpop.xlane.xlu0 %132 }
  0x9f   :  { %v189_v60 = vrot.slane %v133_v57, %v188_v48 }
  0xa0   :  { %v210_v62 = vsel %vm190_vm3, %v209_v56, %v205_v59 }
  0xa1   :  { %v191_v63 = vsel %vm190_vm3, %v189_v60, %v184_v61 }
  0xa2   :  { %v212_v0 = vsel %vm211_vm4, %v210_v62, %v191_v63 }
  0xa3   :  { %323 = vmatmul.mubr.msk.f32.vlgmr.msra.gmra.mrb[0].mxu0 %vm213_vm5, %v212_v0 }
 0x176   :  { %v282_v2 = vpop.f32.mrb[0].mxu0 }
 0x177   :  { %v283_v3 = vadd.f32 %v307_v1, %v282_v2  ;;  %v324_v4 = vpop.f32.mrb[1].mxu0 }
 0x179   :  { %v287_v5 = vmul.f32 0.70710677, %v283_v3  ;;  %v286_v7 = vmul.f32 0.5, %v283_v3 }
 0x17b   :  { %335 = verf.f32 %v287_v5 }
 0x185   :  { %v336_v6 = vpop.eup %335 }
 0x186   :  { %v289_v8 = vadd.f32 1.0, %v336_v6 }
 0x188   :  { %v290_v9 = vmul.f32 %v289_v8, %v286_v7 }
 0x18a   :  { %292 = vst.msk [vmem:[#allocation3] sm:$0x3] %vm291_vm6, %v290_v9 }
 0x18b   :  { %348 = shalt.err (!%p345_p4)
}
 0x18c   :  { %s349_s29 = scalar_lea.hbm %s463_s3, 32 }
 0x18d   :  { %p350_p5 = scmp.ne.s32.totalorder %s463_s3, %s349_s29  ;;  %p353_p6 = scmp.lt.u32.totalorder %s349_s29, %s463_s3 }
 0x18f   :  { %p355_p7 = pnand %p353_p6, %p350_p5 }
 0x191   :  { %358 = shalt.err (!%p355_p7)
}
 0x192   :  { %302 = dma.vmem_to_hbm [thread:$0]  %s300_s26, 32, %s463_s3, [#allocation4]  }
 0x193   :  { %359 = dma.done.wait [#allocation4], 32  }
 0x194   :  { %360 = vsyncadd [#allocation4], 4294967264 }
 0x195   :  { %306 = vsyncpa [#allocation4], 1 }

</bundles_post_ra>
